<compile_context>
chip_gen: v7x
topology: tpu7x:2x2x1
jax: 0.10.0
libtpu: 0.0.40
codegen_flags: <defaults>
</compile_context>

<pallas_src>
import functools

import jax
import jax.numpy as jnp
from jax import lax
from jax.experimental import pallas as pl
from jax.experimental.pallas import tpu as pltpu


def rnn_kernel(x_ref, h0_ref, w0_ref, b0_ref, wr_ref, br_ref,
               w_fc_ref, b_fc_ref, mask_ref, out_ref, h_scratch,
               *, n_layers, seq_len, time_chunk, matmul_dtype, mask_tail):
    t_idx = pl.program_id(1)                    # time-chunk index (sequential)
    n_t = pl.num_programs(1)

    # First chunk of each batch tile: load the initial hidden state.
    @pl.when(t_idx == 0)
    def _():
        h_scratch[...] = h0_ref[...].astype(jnp.float32)

    # Weights / biases: read once per chunk, reused for all Tc steps.
    w0 = w0_ref[...]                            # (I + H, H)  matmul dtype
    b0 = b0_ref[...]                            # (1, H)      f32
    w_rest = [wr_ref[l] for l in range(n_layers - 1)]   # (2H, H) each
    b_rest = [br_ref[l] for l in range(n_layers - 1)]   # (1, H)  each
    w_fc = w_fc_ref[...]                        # (H, O)
    b_fc = b_fc_ref[...]                        # (1, O)

    # Carried hidden state -> registers for the duration of the chunk.
    h_init = tuple(h_scratch[l] for l in range(n_layers))

    def step(s, hs):
        x_t = x_ref[s]                          # (Bt, I) current time step
        inp = x_t.astype(matmul_dtype)
        new_hs = []
        for l in range(n_layers):
            h_prev = hs[l]                      # (Bt, H) f32
            w = w0 if l == 0 else w_rest[l - 1]
            b = b0 if l == 0 else b_rest[l - 1]
            # Fused matmul: concat([inp, h_prev]) @ [w_ih; w_hh] + (b_ih+b_hh).
            z = jnp.concatenate([inp, h_prev.astype(matmul_dtype)], axis=-1)
            h_new = jnp.tanh(
                jnp.dot(z, w, preferred_element_type=jnp.float32) + b)
            if mask_tail:                       # only emitted if T % Tc != 0
                valid = (t_idx * time_chunk + s) < seq_len
                h_new = jnp.where(valid, h_new, h_prev)
            new_hs.append(h_new)
            inp = h_new.astype(matmul_dtype)    # feeds the next layer
        return tuple(new_hs)

    h_final = lax.fori_loop(0, time_chunk, step, h_init,
                            unroll=min(time_chunk, 8))

    # Write the carry back once per chunk (not once per step).
    for l in range(n_layers):
        h_scratch[l] = h_final[l]

    # Last chunk: dropout (single fused multiply, scale folded into the mask)
    # + fc matmul, single output store.
    @pl.when(t_idx == n_t - 1)
    def _():
        top = h_final[n_layers - 1]             # (Bt, H) last-step, top layer
        dropped = top * mask_ref[...]
        out = jnp.dot(dropped.astype(matmul_dtype), w_fc,
                      preferred_element_type=jnp.float32) + b_fc
        out_ref[...] = out.astype(out_ref.dtype)


def rnn_forward(x, hidden, layer_params, w_fc, b_fc, *,
                key=None, training=True, p=0.5,
                time_chunk=None, batch_tile=None,
                matmul_dtype=jnp.float32, vmem_limit_bytes=None):
    """x: (T, B, I); hidden: (L, B, H); layer_params: list of
    (w_ih[in_l, H], b_ih[H], w_hh[H, H], b_hh[H]); w_fc: (H, O); b_fc: (O,).
    Weights are stored transposed from PyTorch's [out, in] convention."""
    T, B, I = x.shape
    L, _, H = hidden.shape
    O = w_fc.shape[1]
    assert T >= 1

    if time_chunk is None:
        time_chunk = min(T, 32)
    time_chunk = max(1, min(time_chunk, T))
    n_tc = pl.cdiv(T, time_chunk)

    if batch_tile is None:
        batch_tile = B
    assert B % batch_tile == 0 and (batch_tile == B or batch_tile % 8 == 0)
    n_b = B // batch_tile

    # Dropout mask computed outside the kernel (deterministic given `key`),
    # inverted-dropout scale folded in -> the kernel applies one multiply.
    if training and p > 0.0:
        if key is None:
            key = jax.random.PRNGKey(0)
        keep = jax.random.bernoulli(key, 1.0 - p, (B, H))
        mask = keep.astype(jnp.float32) * (1.0 / (1.0 - p))
    else:
        mask = jnp.ones((B, H), jnp.float32)

    # Host-side weight fusion:  [w_ih; w_hh] stacked, biases pre-added.
    w_ih0, b_ih0, w_hh0, b_hh0 = layer_params[0]
    w0 = jnp.concatenate([w_ih0, w_hh0], axis=0).astype(matmul_dtype)  # (I+H,H)
    b0 = (b_ih0 + b_hh0).reshape(1, H).astype(jnp.float32)
    if L > 1:
        w_rest = jnp.stack(
            [jnp.concatenate([wi, wh], axis=0)
             for (wi, bi, wh, bh) in layer_params[1:]]).astype(matmul_dtype)
        b_rest = jnp.stack(
            [(bi + bh).reshape(1, H)
             for (wi, bi, wh, bh) in layer_params[1:]]).astype(jnp.float32)
    else:  # dummies, never read by the kernel when L == 1
        w_rest = jnp.zeros((1, 2 * H, H), matmul_dtype)
        b_rest = jnp.zeros((1, 1, H), jnp.float32)
    L_rest = w_rest.shape[0]

    w_fc_c = w_fc.astype(matmul_dtype)
    b_fc_r = b_fc.reshape(1, O).astype(jnp.float32)

    in_specs = [
        # x: one (Tc, Bt, I) slab per grid step (double-buffered by BlockSpec).
        pl.BlockSpec((time_chunk, batch_tile, I), lambda b, t: (t, b, 0)),
        # h0 / weights / mask: constant block index -> VMEM-resident.
        pl.BlockSpec((L, batch_tile, H), lambda b, t: (0, b, 0)),
        pl.BlockSpec((I + H, H), lambda b, t: (0, 0)),
        pl.BlockSpec((1, H), lambda b, t: (0, 0)),
        pl.BlockSpec((L_rest, 2 * H, H), lambda b, t: (0, 0, 0)),
        pl.BlockSpec((L_rest, 1, H), lambda b, t: (0, 0, 0)),
        pl.BlockSpec((H, O), lambda b, t: (0, 0)),
        pl.BlockSpec((1, O), lambda b, t: (0, 0)),
        pl.BlockSpec((batch_tile, H), lambda b, t: (b, 0)),
    ]
    out_spec = pl.BlockSpec((batch_tile, O), lambda b, t: (b, 0))

    kernel = functools.partial(
        rnn_kernel, n_layers=L, seq_len=T, time_chunk=time_chunk,
        matmul_dtype=matmul_dtype, mask_tail=(T % time_chunk != 0))

    compiler_kwargs = dict(
        # Batch tiles are independent recurrences -> "parallel" (uses v7x's 2nd
        # TensorCore); the time axis is a true recurrence -> "arbitrary".
        dimension_semantics=("parallel", "arbitrary"))
    if vmem_limit_bytes is not None:
        compiler_kwargs["vmem_limit_bytes"] = vmem_limit_bytes

    out = pl.pallas_call(
        kernel,
        out_shape=jax.ShapeDtypeStruct((B, O), x.dtype),
        grid_spec=pltpu.PrefetchScalarGridSpec(
            num_scalar_prefetch=0,
            grid=(n_b, n_tc),
            in_specs=in_specs,
            out_specs=out_spec,
            scratch_shapes=[pltpu.VMEM((L, batch_tile, H), jnp.float32)],
        ),
        compiler_params=pltpu.CompilerParams(**compiler_kwargs),
    )(x, hidden, w0, b0, w_rest, b_rest, w_fc_c, b_fc_r, mask)
    return jnp.squeeze(out)   # matches `out.squeeze()` in the PyTorch module


def rnn_reference(x, hidden, layer_params, w_fc, b_fc):
    """Pure-JAX reference of the module's eval-mode forward (dropout=identity)."""
    T = x.shape[0]
    inp_seq = x
    for l, (w_ih, b_ih, w_hh, b_hh) in enumerate(layer_params):
        h_l = hidden[l]
        outs = []
        for t in range(T):
            h_l = jnp.tanh(inp_seq[t] @ w_ih + b_ih + h_l @ w_hh + b_hh)
            outs.append(h_l)
        inp_seq = jnp.stack(outs)
    last = inp_seq[-1]                       # (B, H) top-layer, last time step
    return jnp.squeeze(last @ w_fc + b_fc)


if __name__ == "__main__":
    seq_len, batch = 8, 2
    input_size, hidden_size, output_size, n_layers = 16, 32, 4, 2

    root = jax.random.PRNGKey(0)
    kx, kh, kp, kd = jax.random.split(root, 4)

    x = jax.random.normal(kx, (seq_len, batch, input_size), jnp.float32)
    # initHidden: randn * 0.1
    hidden = 0.1 * jax.random.normal(kh, (n_layers, batch, hidden_size),
                                     jnp.float32)

    # nn.RNN / nn.Linear-style init: U(-1/sqrt(H), 1/sqrt(H)).
    bound = 1.0 / (hidden_size ** 0.5)
    keys = jax.random.split(kp, 4 * n_layers + 2)
    ki = 0
    layer_params = []
    for l in range(n_layers):
        in_l = input_size if l == 0 else hidden_size
        w_ih = jax.random.uniform(keys[ki], (in_l, hidden_size), jnp.float32,
                                  -bound, bound); ki += 1
        b_ih = jax.random.uniform(keys[ki], (hidden_size,), jnp.float32,
                                  -bound, bound); ki += 1
        w_hh = jax.random.uniform(keys[ki], (hidden_size, hidden_size),
                                  jnp.float32, -bound, bound); ki += 1
        b_hh = jax.random.uniform(keys[ki], (hidden_size,), jnp.float32,
                                  -bound, bound); ki += 1
        layer_params.append((w_ih, b_ih, w_hh, b_hh))
    w_fc = jax.random.uniform(keys[ki], (hidden_size, output_size), jnp.float32,
                              -bound, bound); ki += 1
    b_fc = jax.random.uniform(keys[ki], (output_size,), jnp.float32,
                              -bound, bound)

    ref = rnn_reference(x, hidden, layer_params, w_fc, b_fc)

    # Eval-mode forward, f32 matmuls (exactness check), Tc=4 -> 2 time chunks
    # so the cross-chunk hidden carry is exercised.
    y_eval = rnn_forward(x, hidden, layer_params, w_fc, b_fc,
                         training=False, time_chunk=4,
                         matmul_dtype=jnp.float32)
    jax.block_until_ready(y_eval)
    assert y_eval.shape == ref.shape == (batch, output_size)
    assert jnp.allclose(y_eval, ref, atol=1e-4, rtol=1e-4)

    # Eval-mode forward with bf16 matmul operands (v6e/v7x MXU mode): f32
    # accumulation + f32 tanh/bias, looser tolerance.
    y_bf16 = rnn_forward(x, hidden, layer_params, w_fc, b_fc,
                         training=False, time_chunk=4,
                         matmul_dtype=jnp.bfloat16)
    jax.block_until_ready(y_bf16)
    assert y_bf16.shape == (batch, output_size)
    assert jnp.allclose(y_bf16, ref, atol=1e-1, rtol=1e-1)

    # Training-mode forward (module default): stochastic dropout mask.
    y_train = rnn_forward(x, hidden, layer_params, w_fc, b_fc,
                          key=kd, training=True, p=0.5, time_chunk=4)
    jax.block_until_ready(y_train)
    assert y_train.shape == (batch, output_size)

    print("KERNEL_OK")
</pallas_src>

<mosaic_0001>
module attributes {stable_mosaic.version = 11 : i64} {
  func.func @rnn_kernel(%arg0: i32, %arg1: i32, %arg2: memref<4x2x16xf32, #tpu.memory_space<vmem>>, %arg3: memref<2x2x32xf32, #tpu.memory_space<vmem>>, %arg4: memref<48x32xf32, #tpu.memory_space<vmem>>, %arg5: memref<1x32xf32, #tpu.memory_space<vmem>>, %arg6: memref<1x64x32xf32, #tpu.memory_space<vmem>>, %arg7: memref<1x1x32xf32, #tpu.memory_space<vmem>>, %arg8: memref<32x4xf32, #tpu.memory_space<vmem>>, %arg9: memref<1x4xf32, #tpu.memory_space<vmem>>, %arg10: memref<2x32xf32, #tpu.memory_space<vmem>>, %arg11: memref<2x4xf32, #tpu.memory_space<vmem>>, %arg12: memref<2x2x32xf32, #tpu.memory_space<vmem>>) attributes {dimension_semantics = [#tpu.dimension_semantics<parallel>, #tpu.dimension_semantics<arbitrary>], iteration_bounds = array<i64: 1, 2>, scalar_prefetch = 0 : i64, scratch_operands = 1 : i64, tpu.core_type = #tpu.core_type<tc>, window_params = [{transform_indices = @transform_0, window_bounds = array<i64: 4, 2, 16>}, {transform_indices = @transform_1, window_bounds = array<i64: 2, 2, 32>}, {pipeline_mode = #tpu.pipeline_mode<synchronous>, transform_indices = @transform_2, window_bounds = array<i64: 48, 32>}, {pipeline_mode = #tpu.pipeline_mode<synchronous>, transform_indices = @transform_3, window_bounds = array<i64: 1, 32>}, {pipeline_mode = #tpu.pipeline_mode<synchronous>, transform_indices = @transform_4, window_bounds = array<i64: 1, 64, 32>}, {pipeline_mode = #tpu.pipeline_mode<synchronous>, transform_indices = @transform_5, window_bounds = array<i64: 1, 1, 32>}, {pipeline_mode = #tpu.pipeline_mode<synchronous>, transform_indices = @transform_6, window_bounds = array<i64: 32, 4>}, {pipeline_mode = #tpu.pipeline_mode<synchronous>, transform_indices = @transform_7, window_bounds = array<i64: 1, 4>}, {transform_indices = @transform_8, window_bounds = array<i64: 2, 32>}, {transform_indices = @transform_9, window_bounds = array<i64: 2, 4>}]} {
    %c0_i32 = arith.constant 0 : i32
    %0 = arith.cmpi eq, %arg1, %c0_i32 : i32
    %1 = arith.extui %0 : i1 to i32
    %c0_i32_0 = arith.constant 0 : i32
    %2 = arith.cmpi ne, %1, %c0_i32_0 : i32
    scf.if %2 {
      %c0_43 = arith.constant 0 : index
      %c0_44 = arith.constant 0 : index
      %c0_45 = arith.constant 0 : index
      %76 = vector.load %arg3[%c0_43, %c0_44, %c0_45] : memref<2x2x32xf32, #tpu.memory_space<vmem>>, vector<2x2x32xf32>
      %c0_46 = arith.constant 0 : index
      %c0_47 = arith.constant 0 : index
      %c0_48 = arith.constant 0 : index
      %77 = vector.load %arg12[%c0_46, %c0_47, %c0_48] : memref<2x2x32xf32, #tpu.memory_space<vmem>>, vector<2x2x32xf32>
      tpu.vector_store %arg12[%c0_46, %c0_47, %c0_48], %76 {strides = array<i32>} : memref<2x2x32xf32, #tpu.memory_space<vmem>>, vector<2x2x32xf32>,
    } else {
    }
    %c0 = arith.constant 0 : index
    %c0_1 = arith.constant 0 : index
    %3 = vector.load %arg4[%c0, %c0_1] : memref<48x32xf32, #tpu.memory_space<vmem>>, vector<48x32xf32>
    %c0_2 = arith.constant 0 : index
    %c0_3 = arith.constant 0 : index
    %4 = vector.load %arg5[%c0_2, %c0_3] : memref<1x32xf32, #tpu.memory_space<vmem>>, vector<1x32xf32>
    %c0_4 = arith.constant 0 : index
    %c0_5 = arith.constant 0 : index
    %c0_6 = arith.constant 0 : index
    %5 = vector.load %arg6[%c0_4, %c0_5, %c0_6] : memref<1x64x32xf32, #tpu.memory_space<vmem>>, vector<1x64x32xf32>
    %6 = vector.shape_cast %5 : vector<1x64x32xf32> to vector<64x32xf32>
    %c0_7 = arith.constant 0 : index
    %c0_8 = arith.constant 0 : index
    %c0_9 = arith.constant 0 : index
    %7 = vector.load %arg7[%c0_7, %c0_8, %c0_9] : memref<1x1x32xf32, #tpu.memory_space<vmem>>, vector<1x1x32xf32>
    %8 = vector.shape_cast %7 : vector<1x1x32xf32> to vector<1x32xf32>
    %c0_10 = arith.constant 0 : index
    %c0_11 = arith.constant 0 : index
    %9 = vector.load %arg8[%c0_10, %c0_11] : memref<32x4xf32, #tpu.memory_space<vmem>>, vector<32x4xf32>
    %c0_12 = arith.constant 0 : index
    %c0_13 = arith.constant 0 : index
    %10 = vector.load %arg9[%c0_12, %c0_13] : memref<1x4xf32, #tpu.memory_space<vmem>>, vector<1x4xf32>
    %c0_14 = arith.constant 0 : index
    %c0_15 = arith.constant 0 : index
    %c0_16 = arith.constant 0 : index
    %11 = vector.load %arg12[%c0_14, %c0_15, %c0_16] : memref<2x2x32xf32, #tpu.memory_space<vmem>>, vector<1x2x32xf32>
    %12 = vector.shape_cast %11 : vector<1x2x32xf32> to vector<2x32xf32>
    %c1 = arith.constant 1 : index
    %c0_17 = arith.constant 0 : index
    %c0_18 = arith.constant 0 : index
    %13 = vector.load %arg12[%c1, %c0_17, %c0_18] : memref<2x2x32xf32, #tpu.memory_space<vmem>>, vector<1x2x32xf32>
    %14 = vector.shape_cast %13 : vector<1x2x32xf32> to vector<2x32xf32>
    %c0_i32_19 = arith.constant 0 : i32
    %15 = arith.index_cast %c0_i32_19 : i32 to index
    %c0_20 = arith.constant 0 : index
    %c0_21 = arith.constant 0 : index
    %16 = vector.load %arg2[%15, %c0_20, %c0_21] : memref<4x2x16xf32, #tpu.memory_space<vmem>>, vector<1x2x16xf32>
    %17 = vector.shape_cast %16 : vector<1x2x16xf32> to vector<2x16xf32>
    %18 = tpu.concatenate %17, %12 in 1 : vector<2x16xf32>, vector<2x32xf32> -> vector<2x48xf32>
    %cst = arith.constant dense<0.000000e+00> : vector<2x32xf32>
    %19 = tpu.matmul %18, %3, %cst {dimension_numbers = #tpu.dot_dimension_numbers<[1], [0], [0], [1], [0, 0, 1, 1], [], []>} : vector<2x48xf32>, vector<48x32xf32>, vector<2x32xf32> -> vector<2x32xf32>
    %20 = vector.broadcast %4 : vector<1x32xf32> to vector<2x32xf32>
    %21 = arith.addf %19, %20 : vector<2x32xf32>
    %22 = math.tanh %21 : vector<2x32xf32>
    %23 = tpu.concatenate %22, %14 in 1 : vector<2x32xf32>, vector<2x32xf32> -> vector<2x64xf32>
    %cst_22 = arith.constant dense<0.000000e+00> : vector<2x32xf32>
    %24 = tpu.matmul %23, %6, %cst_22 {dimension_numbers = #tpu.dot_dimension_numbers<[1], [0], [0], [1], [0, 0, 1, 1], [], []>} : vector<2x64xf32>, vector<64x32xf32>, vector<2x32xf32> -> vector<2x32xf32>
    %25 = vector.broadcast %8 : vector<1x32xf32> to vector<2x32xf32>
    %26 = arith.addf %24, %25 : vector<2x32xf32>
    %27 = math.tanh %26 : vector<2x32xf32>
    %c1_i32 = arith.constant 1 : i32
    %28 = arith.index_cast %c1_i32 : i32 to index
    %c0_23 = arith.constant 0 : index
    %c0_24 = arith.constant 0 : index
    %29 = vector.load %arg2[%28, %c0_23, %c0_24] : memref<4x2x16xf32, #tpu.memory_space<vmem>>, vector<1x2x16xf32>
    %30 = vector.shape_cast %29 : vector<1x2x16xf32> to vector<2x16xf32>
    %31 = tpu.concatenate %30, %22 in 1 : vector<2x16xf32>, vector<2x32xf32> -> vector<2x48xf32>
    %cst_25 = arith.constant dense<0.000000e+00> : vector<2x32xf32>
    %32 = tpu.matmul %31, %3, %cst_25 {dimension_numbers = #tpu.dot_dimension_numbers<[1], [0], [0], [1], [0, 0, 1, 1], [], []>} : vector<2x48xf32>, vector<48x32xf32>, vector<2x32xf32> -> vector<2x32xf32>
    %33 = vector.broadcast %4 : vector<1x32xf32> to vector<2x32xf32>
    %34 = arith.addf %32, %33 : vector<2x32xf32>
    %35 = math.tanh %34 : vector<2x32xf32>
    %36 = tpu.concatenate %35, %27 in 1 : vector<2x32xf32>, vector<2x32xf32> -> vector<2x64xf32>
    %cst_26 = arith.constant dense<0.000000e+00> : vector<2x32xf32>
    %37 = tpu.matmul %36, %6, %cst_26 {dimension_numbers = #tpu.dot_dimension_numbers<[1], [0], [0], [1], [0, 0, 1, 1], [], []>} : vector<2x64xf32>, vector<64x32xf32>, vector<2x32xf32> -> vector<2x32xf32>
    %38 = vector.broadcast %8 : vector<1x32xf32> to vector<2x32xf32>
    %39 = arith.addf %37, %38 : vector<2x32xf32>
    %40 = math.tanh %39 : vector<2x32xf32>
    %c2_i32 = arith.constant 2 : i32
    %41 = arith.index_cast %c2_i32 : i32 to index
    %c0_27 = arith.constant 0 : index
    %c0_28 = arith.constant 0 : index
    %42 = vector.load %arg2[%41, %c0_27, %c0_28] : memref<4x2x16xf32, #tpu.memory_space<vmem>>, vector<1x2x16xf32>
    %43 = vector.shape_cast %42 : vector<1x2x16xf32> to vector<2x16xf32>
    %44 = tpu.concatenate %43, %35 in 1 : vector<2x16xf32>, vector<2x32xf32> -> vector<2x48xf32>
    %cst_29 = arith.constant dense<0.000000e+00> : vector<2x32xf32>
    %45 = tpu.matmul %44, %3, %cst_29 {dimension_numbers = #tpu.dot_dimension_numbers<[1], [0], [0], [1], [0, 0, 1, 1], [], []>} : vector<2x48xf32>, vector<48x32xf32>, vector<2x32xf32> -> vector<2x32xf32>
    %46 = vector.broadcast %4 : vector<1x32xf32> to vector<2x32xf32>
    %47 = arith.addf %45, %46 : vector<2x32xf32>
    %48 = math.tanh %47 : vector<2x32xf32>
    %49 = tpu.concatenate %48, %40 in 1 : vector<2x32xf32>, vector<2x32xf32> -> vector<2x64xf32>
    %cst_30 = arith.constant dense<0.000000e+00> : vector<2x32xf32>
    %50 = tpu.matmul %49, %6, %cst_30 {dimension_numbers = #tpu.dot_dimension_numbers<[1], [0], [0], [1], [0, 0, 1, 1], [], []>} : vector<2x64xf32>, vector<64x32xf32>, vector<2x32xf32> -> vector<2x32xf32>
    %51 = vector.broadcast %8 : vector<1x32xf32> to vector<2x32xf32>
    %52 = arith.addf %50, %51 : vector<2x32xf32>
    %53 = math.tanh %52 : vector<2x32xf32>
    %c3_i32 = arith.constant 3 : i32
    %54 = arith.index_cast %c3_i32 : i32 to index
    %c0_31 = arith.constant 0 : index
    %c0_32 = arith.constant 0 : index
    %55 = vector.load %arg2[%54, %c0_31, %c0_32] : memref<4x2x16xf32, #tpu.memory_space<vmem>>, vector<1x2x16xf32>
    %56 = vector.shape_cast %55 : vector<1x2x16xf32> to vector<2x16xf32>
    %57 = tpu.concatenate %56, %48 in 1 : vector<2x16xf32>, vector<2x32xf32> -> vector<2x48xf32>
    %cst_33 = arith.constant dense<0.000000e+00> : vector<2x32xf32>
    %58 = tpu.matmul %57, %3, %cst_33 {dimension_numbers = #tpu.dot_dimension_numbers<[1], [0], [0], [1], [0, 0, 1, 1], [], []>} : vector<2x48xf32>, vector<48x32xf32>, vector<2x32xf32> -> vector<2x32xf32>
    %59 = vector.broadcast %4 : vector<1x32xf32> to vector<2x32xf32>
    %60 = arith.addf %58, %59 : vector<2x32xf32>
    %61 = math.tanh %60 : vector<2x32xf32>
    %62 = tpu.concatenate %61, %53 in 1 : vector<2x32xf32>, vector<2x32xf32> -> vector<2x64xf32>
    %cst_34 = arith.constant dense<0.000000e+00> : vector<2x32xf32>
    %63 = tpu.matmul %62, %6, %cst_34 {dimension_numbers = #tpu.dot_dimension_numbers<[1], [0], [0], [1], [0, 0, 1, 1], [], []>} : vector<2x64xf32>, vector<64x32xf32>, vector<2x32xf32> -> vector<2x32xf32>
    %64 = vector.broadcast %8 : vector<1x32xf32> to vector<2x32xf32>
    %65 = arith.addf %63, %64 : vector<2x32xf32>
    %66 = math.tanh %65 : vector<2x32xf32>
    %c4_i32 = arith.constant 4 : i32
    %c0_35 = arith.constant 0 : index
    %c0_36 = arith.constant 0 : index
    %c0_37 = arith.constant 0 : index
    %67 = vector.load %arg12[%c0_35, %c0_36, %c0_37] : memref<2x2x32xf32, #tpu.memory_space<vmem>>, vector<1x2x32xf32>
    %68 = vector.shape_cast %67 : vector<1x2x32xf32> to vector<2x32xf32>
    %69 = vector.shape_cast %61 : vector<2x32xf32> to vector<1x2x32xf32>
    tpu.vector_store %arg12[%c0_35, %c0_36, %c0_37], %69 {strides = array<i32>} : memref<2x2x32xf32, #tpu.memory_space<vmem>>, vector<1x2x32xf32>,
    %c1_38 = arith.constant 1 : index
    %c0_39 = arith.constant 0 : index
    %c0_40 = arith.constant 0 : index
    %70 = vector.load %arg12[%c1_38, %c0_39, %c0_40] : memref<2x2x32xf32, #tpu.memory_space<vmem>>, vector<1x2x32xf32>
    %71 = vector.shape_cast %70 : vector<1x2x32xf32> to vector<2x32xf32>
    %72 = vector.shape_cast %66 : vector<2x32xf32> to vector<1x2x32xf32>
    tpu.vector_store %arg12[%c1_38, %c0_39, %c0_40], %72 {strides = array<i32>} : memref<2x2x32xf32, #tpu.memory_space<vmem>>, vector<1x2x32xf32>,
    %c1_i32_41 = arith.constant 1 : i32
    %73 = arith.cmpi eq, %arg1, %c1_i32_41 : i32
    %74 = arith.extui %73 : i1 to i32
    %c0_i32_42 = arith.constant 0 : i32
    %75 = arith.cmpi ne, %74, %c0_i32_42 : i32
    scf.if %75 {
      %c0_43 = arith.constant 0 : index
      %c0_44 = arith.constant 0 : index
      %76 = vector.load %arg10[%c0_43, %c0_44] : memref<2x32xf32, #tpu.memory_space<vmem>>, vector<2x32xf32>
      %77 = arith.mulf %66, %76 : vector<2x32xf32>
      %cst_45 = arith.constant dense<0.000000e+00> : vector<2x4xf32>
      %78 = tpu.matmul %77, %9, %cst_45 {dimension_numbers = #tpu.dot_dimension_numbers<[1], [0], [0], [1], [0, 0, 1, 1], [], []>} : vector<2x32xf32>, vector<32x4xf32>, vector<2x4xf32> -> vector<2x4xf32>
      %79 = vector.broadcast %10 : vector<1x4xf32> to vector<2x4xf32>
      %80 = arith.addf %78, %79 : vector<2x4xf32>
      %c0_46 = arith.constant 0 : index
      %c0_47 = arith.constant 0 : index
      %81 = vector.load %arg11[%c0_46, %c0_47] : memref<2x4xf32, #tpu.memory_space<vmem>>, vector<2x4xf32>
      tpu.vector_store %arg11[%c0_46, %c0_47], %80 {strides = array<i32>} : memref<2x4xf32, #tpu.memory_space<vmem>>, vector<2x4xf32>,
    } else {
    }
    return
  }
  func.func @transform_0(%arg0: i32, %arg1: i32) -> (i32, i32, i32) {
    %c0_i32 = arith.constant 0 : i32
    %c0_i32_0 = arith.constant 0 : i32
    return %arg1, %arg0, %c0_i32 : i32, i32, i32
  }
  func.func @transform_1(%arg0: i32, %arg1: i32) -> (i32, i32, i32) {
    %c0_i32 = arith.constant 0 : i32
    %c0_i32_0 = arith.constant 0 : i32
    %c0_i32_1 = arith.constant 0 : i32
    return %c0_i32, %arg0, %c0_i32_0 : i32, i32, i32
  }
  func.func @transform_2(%arg0: i32, %arg1: i32) -> (i32, i32) {
    %c0_i32 = arith.constant 0 : i32
    %c0_i32_0 = arith.constant 0 : i32
    %c0_i32_1 = arith.constant 0 : i32
    return %c0_i32, %c0_i32_0 : i32, i32
  }
  func.func @transform_3(%arg0: i32, %arg1: i32) -> (i32, i32) {
    %c0_i32 = arith.constant 0 : i32
    %c0_i32_0 = arith.constant 0 : i32
    %c0_i32_1 = arith.constant 0 : i32
    return %c0_i32, %c0_i32_0 : i32, i32
  }
  func.func @transform_4(%arg0: i32, %arg1: i32) -> (i32, i32, i32) {
    %c0_i32 = arith.constant 0 : i32
    %c0_i32_0 = arith.constant 0 : i32
    %c0_i32_1 = arith.constant 0 : i32
    %c0_i32_2 = arith.constant 0 : i32
    return %c0_i32, %c0_i32_0, %c0_i32_1 : i32, i32, i32
  }
  func.func @transform_5(%arg0: i32, %arg1: i32) -> (i32, i32, i32) {
    %c0_i32 = arith.constant 0 : i32
    %c0_i32_0 = arith.constant 0 : i32
    %c0_i32_1 = arith.constant 0 : i32
    %c0_i32_2 = arith.constant 0 : i32
    return %c0_i32, %c0_i32_0, %c0_i32_1 : i32, i32, i32
  }
  func.func @transform_6(%arg0: i32, %arg1: i32) -> (i32, i32) {
    %c0_i32 = arith.constant 0 : i32
    %c0_i32_0 = arith.constant 0 : i32
    %c0_i32_1 = arith.constant 0 : i32
    return %c0_i32, %c0_i32_0 : i32, i32
  }
  func.func @transform_7(%arg0: i32, %arg1: i32) -> (i32, i32) {
    %c0_i32 = arith.constant 0 : i32
    %c0_i32_0 = arith.constant 0 : i32
    %c0_i32_1 = arith.constant 0 : i32
    return %c0_i32, %c0_i32_0 : i32, i32
  }
  func.func @transform_8(%arg0: i32, %arg1: i32) -> (i32, i32) {
    %c0_i32 = arith.constant 0 : i32
    %c0_i32_0 = arith.constant 0 : i32
    return %arg0, %c0_i32 : i32, i32
  }
  func.func @transform_9(%arg0: i32, %arg1: i32) -> (i32, i32) {
    %c0_i32 = arith.constant 0 : i32
    %c0_i32_0 = arith.constant 0 : i32
    return %arg0, %c0_i32 : i32, i32
  }
}

</mosaic_0001>

<bundles_post_ra>
// kernel: tpu_custom_call.1
= control target key start
LH: loop header
LB: loop body
LE: loop exit
PB: predicated region body
PF: predicated region fallthrough
CT: control target
= control target key end

     0   :  { %14 = vsyncpa [#allocation4], 0  ;;  %s1756_s30 = smov 0   ;;  %s1758_s10 = smov 0   ;;  %s2036_s0 = inlined_call_operand.vmem [shape: f32[8,2,16], index: 0, kind: input, shape index: {}]   ;;  %s2037_s1 = inlined_call_operand.vmem [shape: f32[2,2,32], index: 1, kind: input, shape index: {}]   ;;  %s2038_s2 = inlined_call_operand.vmem [shape: f32[48,32], index: 2, kind: input, shape index: {}]   ;;  %s2039_s3 = inlined_call_operand.vmem [shape: f32[1,32], index: 3, kind: input, shape index: {}]   ;;  %s2040_s4 = inlined_call_operand.vmem [shape: f32[1,64,32], index: 4, kind: input, shape index: {}]   ;;  %s2041_s5 = inlined_call_operand.vmem [shape: f32[1,1,32], index: 5, kind: input, shape index: {}]   ;;  %s2042_s6 = inlined_call_operand.vmem [shape: f32[32,4], index: 6, kind: input, shape index: {}]   ;;  %s2043_s7 = inlined_call_operand.vmem [shape: f32[1,4], index: 7, kind: input, shape index: {}]   ;;  %s2044_s8 = inlined_call_operand.vmem [shape: f32[2,32], index: 8, kind: input, shape index: {}]   ;;  %s2045_s9 = inlined_call_operand.hbm [shape: f32[2,4], index: 9, kind: output, shape index: {}]  }
   0x1   :  { %s1760_s11 = smov 0  }
   0x2 LB: > { %s1253_s12 = sadd.s32 4294967295, %s1695_s11   ;;  %s29_s13 = sadd.s32 1, %s1691_s10  ;;  %s1695_s11 = sphi %s1760_s11, %s20_s11   ;;  %s1691_s10 = sphi %s1758_s10, %s2048_s10   ;;  %s1687_s30 = sphi %s1756_s30, %s2047_s30  }
   0x3   : > { %p30_p0 = scmp.ge.s32.totalorder %s29_s13, 2  ;;  %p1258_p1 = scmp.ge.s32.totalorder %s1695_s11, 1 }
   0x4   : > { %p324_p2 = scmp.lt.s32.totalorder %s1695_s11, 3 }
   0x5   : > { %s2050_s13 = smov (%p30_p0, %s29_s13), 0 }
   0x6   : > { %p325_p3 = pnand %p1258_p1, %p324_p2 }
   0x7   : > { %s1259_s14 = sshll.u32 (!%p325_p3), %s1687_s30, 2  ;;  %p1261_p5 = scmp.ne.s32.totalorder (!%p325_p3), %s1687_s30, 0 }
   0x8   : > { %328 = sbr.rel (%p325_p3) target bundleno = 1857 (0x741), region = 56  ;;  %p367_p4 = scmp.lt.s32.totalorder (!%p325_p3), %s1259_s14, 7 }
   0xf   : > { %s2052_s14 = smov (!%p367_p4, %s1259_s14), 7  ;;  %386 = sbr.rel (%p1261_p5) target bundleno = 22 (0x16), region = 60 }
  0x10   : > { %s1260_s15 = sshll.u32 %s2052_s14, 1  ;;  %v387_v0 = vld [vmem:[%s2037_s1] sm:$0x3] (!%p1261_p5)  ;;  %vm389_vm0 = vcmask (!%p1261_p5), 254976   ;;  %v388_v1 = vld [vmem:[%s2037_s1 + $0x2] sm:$0x3] (!%p1261_p5) }
  0x11   : > { %s1781_s18 = scalar_lea.vmem %s2036_s0, %s1260_s15  ;;  %390 = vst.msk [vmem:[#allocation2] sm:$0x3] (!%p1261_p5), %vm389_vm0, %v387_v0  ;;  %391 = vst.msk [vmem:[#allocation2 + $0x2] sm:$0x3] (!%p1261_p5), %vm389_vm0, %v388_v1 }
  0x16 PF: > { %v1793_v3 = vld [vmem:[%s2042_s6] sm:$0xff]  ;;  %v1798_v4 = vld [vmem:[%s2042_s6 + $0x8] sm:$0xff]  ;;  %s1697_s27 = smov 16   ;;  %v1804_v5 = vld [vmem:[%s2042_s6 + $0x10] sm:$0xff]  ;;  %v1698_v8 = vmov 0.0|0.0   ;;  %vm1699_vm1 = vmmov 0  }
  0x17   : > { %v1809_v6 = vld [vmem:[%s2042_s6 + $0x18] sm:$0xff]  ;;  %v1814_v7 = vld [vmem:[%s2043_s7] ss:$0 sm:$0xff]  ;;  %1498 = vmatprep.subr.bf16.mxu1 %v1698_v8  ;;  %v393_v10 = vld [vmem:[%s2038_s2 + $0x8] sm:$0xff]  ;;  %1519 = vmatprep.subr.bf16.mxu0 %v1698_v8  ;;  %v1700_v14 = vmov 0.0   ;;  %s1701_s28 = smov 32  }
  0x18   : > { %v413_v2 = vld [vmem:[#allocation2] sm:$0x3]  ;;  %v394_v11 = vld [vmem:[%s2038_s2 + $0x10] sm:$0xff]  ;;  %v395_v13 = vld [vmem:[%s2038_s2 + $0x18] sm:$0xff]  ;;  %1363 = vmatprep.mubr.msk.f32.mxu1 %vm1699_vm1, %v1700_v14  ;;  %1397 = vmatprep.mubr.msk.f32.mxu0 %vm1699_vm1, %v1700_v14  ;;  %vm421_vm2 = vcmask 130048   ;;  %vm429_vm3 = vcmask 392192  }
  0x19   : > { %418 = vrot.lane.b32.xlu0 %v413_v2, %s1697_s27  ;;  %v392_v9 = vld [vmem:[%s2038_s2] sm:$0xff]  ;;  %v1837_v16 = vpack.c.bf16 %v395_v13, %v394_v11  ;;  %v397_v18 = vld [vmem:[%s2038_s2 + $0x28] sm:$0xff]  ;;  %v401_v26 = vld [vmem:[%s2040_s4 + $0x10] sm:$0xff]  ;;  %vm508_vm4 = vcmask 261120   ;;  %vm516_vm5 = vcmask 523264   ;;  %vm1071_vm6 = vcmask 254976  }
  0x1a   : > { %v1827_v12 = vpack.c.bf16 %v393_v10, %v392_v9  ;;  %v415_v15 = vld [vmem:[#allocation2 + $0x2] sm:$0x3]  ;;  %v416_v20 = vld [vmem:[%s1781_s18] sm:$0x3]  ;;  %v400_v24 = vld [vmem:[%s2040_s4 + $0x8] sm:$0xff]  ;;  %p1275_p6 = scmp.ne.s32.totalorder %s1687_s30, 1 }
  0x1b   : > { %v396_v17 = vld [vmem:[%s2038_s2 + $0x20] sm:$0xff]  ;;  %v402_v27 = vld [vmem:[%s2040_s4 + $0x18] sm:$0xff]  ;;  %v404_v30 = vld [vmem:[%s2040_s4 + $0x28] sm:$0xff]  ;;  %vm1703_vm7 = vmmov (!%p1275_p6), 0   ;;  %vm1159_vm8 = vcmask (!%p1275_p6), 25600  }
  0x1c   : > { %1500 = vmatpush3.bf16.msra.mxu1 %v1827_v12  ;;  %1521 = vmatpush3.bf16.msra.mxu0 %v1827_v12  ;;  %v1850_v19 = vpack.c.bf16 %v397_v18, %v396_v17  ;;  %v399_v23 = vld [vmem:[%s2040_s4] sm:$0xff]  ;;  %v1880_v28 = vpack.c.bf16 %v402_v27, %v401_v26  ;;  %v405_v32 = vld [vmem:[%s2040_s4 + $0x30] sm:$0xff]  ;;  %v406_v33 = vld [vmem:[%s2040_s4 + $0x38] sm:$0xff]  ;;  %v1583_v27 = vpack.c.bf16 (!%p1275_p6), %v1798_v4, %v1793_v3 }
  0x1d   : > { %505 = vrot.lane.b32.xlu0 %v415_v15, %s1701_s28  ;;  %1501 = vmatprep.subr.bf16.mxu1 %v1698_v8  ;;  %v1870_v25 = vpack.c.bf16 %v400_v24, %v399_v23  ;;  %v403_v29 = vld [vmem:[%s2040_s4 + $0x20] sm:$0xff]  ;;  %v1899_v34 = vpack.c.bf16 %v406_v33, %v405_v32 }
  0x1e   : > { %1522 = vmatprep.subr.bf16.mxu0 %v1698_v8  ;;  %v1889_v31 = vpack.c.bf16 %v404_v30, %v403_v29  ;;  %v1907_v35 = vld [vmem:[%s2039_s3] ss:$0 sm:$0xff]  ;;  %v1266_v42 = vld [vmem:[%s1781_s18 + $0x2] sm:$0x3]  ;;  %v1269_v56 = vld [vmem:[%s1781_s18 + $0x4] sm:$0x3]  ;;  %v1586_v29 = vpack.c.bf16 (!%p1275_p6), %v1809_v6, %v1804_v5 }
  0x1f   : > { %v1937_v45 = vld [vmem:[%s2041_s5] ss:$0 sm:$0xff]  ;;  %v1272_v11 = vld [vmem:[%s1781_s18 + $0x6] sm:$0x3]  ;;  %v1704_v30 = vmov (!%p1275_p6), 0.0  }
  0x20   : > { %1503 = vmatpush3.bf16.msra.mxu1 %v1837_v16  ;;  %1524 = vmatpush3.bf16.msra.mxu0 %v1837_v16 }
  0x21   : > { %1504 = vmatprep.subr.bf16.mxu1 %v1698_v8  ;;  %1525 = vmatprep.subr.bf16.mxu0 %v1698_v8 }
  0x24   : > { %1506 = vmatpush3.bf16.msra.mxu1 %v1850_v19  ;;  %1527 = vmatpush3.bf16.msra.mxu0 %v1850_v19 }
  0x25   : > { %1507 = vmatprep.subr.bf16.mxu1 %v1698_v8  ;;  %1540 = vmatprep.subr.bf16.mxu0 %v1698_v8 }
  0x8b   : > { %v419_v21 = vpop.permute.xlu0 %418 }
  0x8c   : > { %v422_v22 = vsel %vm421_vm2, %v416_v20, %v419_v21 }
  0x8d   : > { %1364 = vmatmul.mubr.msk.f32.vlgmr.msra.gmra.mrb[0].mxu1 %vm429_vm3, %v422_v22 }
  0x8e   : > { %1382 = vmatprep.mubr.msk.f32.mxu1 %vm1699_vm1, %v1700_v14  ;;  %1509 = vmatpush3.bf16.msra.mxu1 %v1870_v25 }
  0x8f   : > { %1510 = vmatprep.subr.bf16.mxu1 %v1698_v8  ;;  %v506_v39 = vpop.permute.xlu0 %505 }
  0x92   : > { %1512 = vmatpush3.bf16.msra.mxu1 %v1880_v28 }
  0x93   : > { %1513 = vmatprep.subr.bf16.mxu1 %v1698_v8 }
  0x96   : > { %1515 = vmatpush3.bf16.msra.mxu1 %v1889_v31 }
  0x97   : > { %1516 = vmatprep.subr.bf16.mxu1 %v1698_v8 }
  0x9a   : > { %1518 = vmatpush3.bf16.msra.mxu1 %v1899_v34 }
  0x9b   : > { %1528 = vmatprep.subr.bf16.mxu1 %v1698_v8 }
 0x160   : > { %v499_v36 = vpop.f32.mrb[0].mxu1 }
 0x161   : > { %v500_v37 = vadd.f32 %v1907_v35, %v499_v36  ;;  %v1365_v38 = vpop.f32.mrb[1].mxu1 }
 0x163   : > { %1627 = vtanh.f32 %v500_v37 }
 0x16d   : > { %v1628_v40 = vpop.eup %1627 }
 0x16e   : > { %v509_v41 = vsel %vm508_vm4, %v1628_v40, %v506_v39  ;;  %594 = vrot.lane.b32.xlu1 %v1628_v40, %s1697_s27 }
 0x16f   : > { %1383 = vmatmul.mubr.msk.f32.vlgmr.msra.gmra.mrb[2].mxu1 %vm516_vm5, %v509_v41 }
 0x170   : > { %1530 = vmatpush3.bf16.msra.mxu1 %v1870_v25  ;;  %1416 = vmatprep.mubr.msk.f32.mxu1 %vm1699_vm1, %v1700_v14 }
 0x171   : > { %1531 = vmatprep.subr.bf16.mxu1 %v1698_v8 }
 0x174   : > { %1533 = vmatpush3.bf16.msra.mxu1 %v1880_v28 }
 0x175   : > { %1534 = vmatprep.subr.bf16.mxu1 %v1698_v8 }
 0x178   : > { %1536 = vmatpush3.bf16.msra.mxu1 %v1889_v31 }
 0x179   : > { %1537 = vmatprep.subr.bf16.mxu1 %v1698_v8 }
 0x17c   : > { %1539 = vmatpush3.bf16.msra.mxu1 %v1899_v34 }
 0x17d   : > { %1549 = vmatprep.subr.bf16.mxu1 %v1698_v8 }
 0x1e0   : > { %v595_v43 = vpop.permute.xlu1 %594 }
 0x1e1   : > { %v597_v44 = vsel %vm421_vm2, %v1266_v42, %v595_v43 }
 0x1e2   : > { %1398 = vmatmul.mubr.msk.f32.vlgmr.msra.gmra.mrb[0].mxu0 %vm429_vm3, %v597_v44 }
 0x1e3   : > { %1542 = vmatpush3.bf16.msra.mxu0 %v1827_v12  ;;  %1431 = vmatprep.mubr.msk.f32.mxu0 %vm1699_vm1, %v1700_v14 }
 0x1e4   : > { %1543 = vmatprep.subr.bf16.mxu0 %v1698_v8 }
 0x1e7   : > { %1545 = vmatpush3.bf16.msra.mxu0 %v1837_v16 }
 0x1e8   : > { %1546 = vmatprep.subr.bf16.mxu0 %v1698_v8 }
 0x1eb   : > { %1548 = vmatpush3.bf16.msra.mxu0 %v1850_v19 }
 0x1ec   : > { %1561 = vmatprep.subr.bf16.mxu0 %v1698_v8 }
 0x242   : > { %v586_v46 = vpop.f32.mrb[2].mxu1 }
 0x243   : > { %v587_v47 = vadd.f32 %v1937_v45, %v586_v46  ;;  %v1384_v48 = vpop.f32.mrb[3].mxu1 }
 0x245   : > { %1629 = vtanh.f32 %v587_v47 }
 0x24f   : > { %v1630_v49 = vpop.eup %1629 }
 0x250   : > { %673 = vrot.lane.b32.xlu1 %v1630_v49, %s1701_s28 }
 0x2b5   : > { %v667_v50 = vpop.f32.mrb[0].mxu0 }
 0x2b6   : > { %v668_v51 = vadd.f32 %v1907_v35, %v667_v50  ;;  %v1399_v52 = vpop.f32.mrb[1].mxu0 }
 0x2b8   : > { %1631 = vtanh.f32 %v668_v51 }
 0x2c2   : > { %v1632_v53 = vpop.eup %1631  ;;  %v674_v54 = vpop.permute.xlu1 %673 }
 0x2c3   : > { %v676_v55 = vsel %vm508_vm4, %v1632_v53, %v674_v54  ;;  %754 = vrot.lane.b32.xlu0 %v1632_v53, %s1697_s27 }
 0x2c4   : > { %1417 = vmatmul.mubr.msk.f32.vlgmr.msra.gmra.mrb[4].mxu1 %vm516_vm5, %v676_v55 }
 0x2c5   : > { %1551 = vmatpush3.bf16.msra.mxu1 %v1870_v25  ;;  %1450 = vmatprep.mubr.msk.f32.mxu1 %vm1699_vm1, %v1700_v14 }
 0x2c6   : > { %1552 = vmatprep.subr.bf16.mxu1 %v1698_v8 }
 0x2c9   : > { %1554 = vmatpush3.bf16.msra.mxu1 %v1880_v28 }
 0x2ca   : > { %1555 = vmatprep.subr.bf16.mxu1 %v1698_v8 }
 0x2cd   : > { %1557 = vmatpush3.bf16.msra.mxu1 %v1889_v31 }
 0x2ce   : > { %1558 = vmatprep.subr.bf16.mxu1 %v1698_v8 }
 0x2d1   : > { %1560 = vmatpush3.bf16.msra.mxu1 %v1899_v34 }
 0x335   : > { %v755_v57 = vpop.permute.xlu0 %754 }
 0x336   : > { %v757_v58 = vsel %vm421_vm2, %v1269_v56, %v755_v57 }
 0x337   : > { %1432 = vmatmul.mubr.msk.f32.vlgmr.msra.gmra.mrb[2].mxu0 %vm429_vm3, %v757_v58 }
 0x338   : > { %1563 = vmatpush3.bf16.msra.mxu0 %v1827_v12  ;;  %1465 = vmatprep.mubr.msk.f32.mxu0 %vm1699_vm1, %v1700_v14 }
 0x339   : > { %1564 = vmatprep.subr.bf16.mxu0 %v1698_v8 }
 0x33c   : > { %1566 = vmatpush3.bf16.msra.mxu0 %v1837_v16 }
 0x33d   : > { %1567 = vmatprep.subr.bf16.mxu0 %v1698_v8 }
 0x340   : > { %1569 = vmatpush3.bf16.msra.mxu0 %v1850_v19 }
 0x341   : > { %1570 = vmatprep.subr.bf16.mxu0 %v1698_v8 }
 0x397   : > { %v746_v59 = vpop.f32.mrb[4].mxu1 }
 0x398   : > { %v747_v60 = vadd.f32 %v1937_v45, %v746_v59  ;;  %v1418_v61 = vpop.f32.mrb[5].mxu1 }
 0x39a   : > { %1633 = vtanh.f32 %v747_v60 }
 0x3a4   : > { %v1634_v62 = vpop.eup %1633 }
 0x3a5   : > { %833 = vrot.lane.b32.xlu1 %v1634_v62, %s1701_s28 }
 0x40a   : > { %v827_v63 = vpop.f32.mrb[2].mxu0 }
 0x40b   : > { %v828_v0 = vadd.f32 %v1907_v35, %v827_v63  ;;  %v1433_v1 = vpop.f32.mrb[3].mxu0 }
 0x40d   : > { %1635 = vtanh.f32 %v828_v0 }
 0x417   : > { %v1636_v2 = vpop.eup %1635  ;;  %v834_v9 = vpop.permute.xlu1 %833 }
 0x418   : > { %v836_v10 = vsel %vm508_vm4, %v1636_v2, %v834_v9  ;;  %914 = vrot.lane.b32.xlu0 %v1636_v2, %s1697_s27 }
 0x419   : > { %1451 = vmatmul.mubr.msk.f32.vlgmr.msra.gmra.mrb[6].mxu1 %vm516_vm5, %v836_v10 }
 0x48a   : > { %v915_v12 = vpop.permute.xlu0 %914 }
 0x48b   : > { %v917_v13 = vsel %vm421_vm2, %v1272_v11, %v915_v12 }
 0x48c   : > { %1466 = vmatmul.mubr.msk.f32.vlgmr.msra.gmra.mrb[4].mxu0 %vm429_vm3, %v917_v13 }
 0x48d   : > { %1572 = vmatpush3.bf16.msra.mxu0 %v1870_v25  ;;  %1484 = vmatprep.mubr.msk.f32.mxu0 %vm1699_vm1, %v1700_v14 }
 0x48e   : > { %1573 = vmatprep.subr.bf16.mxu0 %v1698_v8 }
 0x491   : > { %1575 = vmatpush3.bf16.msra.mxu0 %v1880_v28  ;;  %v1702_v28 = vmov (!%p1275_p6), 0.0|0.0  }
 0x492   : > { %1576 = vmatprep.subr.bf16.mxu0 %v1698_v8 }
 0x495   : > { %1578 = vmatpush3.bf16.msra.mxu0 %v1889_v31  ;;  %v1078_v31 = vld [vmem:[%s2044_s8] sm:$0x3] (!%p1275_p6) }
 0x496   : > { %1579 = vmatprep.subr.bf16.mxu0 %v1698_v8 }
 0x499   : > { %1581 = vmatpush3.bf16.msra.mxu0 %v1899_v34 }
 0x49a   : > { %1582 = vmatprep.subr.bf16.mxu0 (!%p1275_p6), %v1702_v28 }
 0x4ec   : > { %v906_v15 = vpop.f32.mrb[6].mxu1 }
 0x4ed   : > { %v907_v16 = vadd.f32 %v1937_v45, %v906_v15  ;;  %v1452_v17 = vpop.f32.mrb[7].mxu1 }
 0x4ef   : > { %1637 = vtanh.f32 %v907_v16 }
 0x4f9   : > { %v1638_v18 = vpop.eup %1637 }
 0x4fa   : > { %993 = vrot.lane.b32.xlu1 %v1638_v18, %s1701_s28 }
 0x55f   : > { %v987_v14 = vpop.f32.mrb[4].mxu0 }
 0x560   : > { %v988_v19 = vadd.f32 %v1907_v35, %v987_v14  ;;  %v1467_v20 = vpop.f32.mrb[5].mxu0 }
 0x562   : > { %1639 = vtanh.f32 %v988_v19 }
 0x56c   : > { %v1640_v21 = vpop.eup %1639  ;;  %v994_v22 = vpop.permute.xlu1 %993 }
 0x56d   : > { %1072 = vst.msk [vmem:[#allocation2] sm:$0x3] %vm1071_vm6, %v1640_v21  ;;  %v996_v8 = vsel %vm508_vm4, %v1640_v21, %v994_v22 }
 0x56e   : > { %1485 = vmatmul.mubr.msk.f32.vlgmr.msra.gmra.mrb[6].mxu0 %vm516_vm5, %v996_v8 }
 0x56f   : > { %1584 = vmatpush3.bf16.msra.mxu0 (!%p1275_p6), %v1583_v27  ;;  %1495 = vmatprep.mubr.msk.f32.mxu0 (!%p1275_p6), %vm1703_vm7, %v1704_v30 }
 0x570   : > { %1585 = vmatprep.subr.bf16.mxu0 (!%p1275_p6), %v1702_v28 }
 0x573   : > { %1587 = vmatpush3.bf16.msra.mxu0 (!%p1275_p6), %v1586_v29 }
 0x641   : > { %v1066_v23 = vpop.f32.mrb[6].mxu0 }
 0x642   : > { %v1067_v24 = vadd.f32 %v1937_v45, %v1066_v23  ;;  %v1486_v25 = vpop.f32.mrb[7].mxu0 }
 0x644   : > { %1641 = vtanh.f32 %v1067_v24 }
 0x649   : > { %1077 = sbr.rel (%p1275_p6) target bundleno = 1832 (0x728), region = 64 }
 0x64e   : > { %v1642_v26 = vpop.eup %1641 }
 0x64f   : > { %1073 = vst.msk [vmem:[#allocation2 + $0x2] sm:$0x3] %vm1071_vm6, %v1642_v26  ;;  %v1079_v32 = vmul.f32 (!%p1275_p6), %v1642_v26, %v1078_v31 }
 0x651   : > { %1496 = vmatmul.mubr.msk.f32.vlgmr.msra.gmra.mrb[0].mxu0 %vm508_vm4, %v1079_v32 }
 0x724   : > { %v1155_v33 = vpop.f32.mrb[0].mxu0 }
 0x725   : > { %v1156_v3 = vadd.f32 %v1814_v7, %v1155_v33  ;;  %v1497_v4 = vpop.f32.mrb[1].mxu0 }
 0x727   : > { %1160 = vst.msk [vmem:[#allocation3] sm:$0x3] %vm1159_vm8, %v1156_v3 }
 0x728 PF: > { %p2001_p7 = scmp.eq.s32.totalorder %s1253_s12, 1  ;;  %s1705_s28 = smov [#allocation3]  }
 0x729   : > { %s1170_s25 = sshll.u32 %s1705_s28, 4  ;;  %s1171_s25 = int_to_ptr.vmem [resolvable:$true] %s1170_s25 }
 0x72a   : > { %s1643_s26 = scalar_lea.vmem %s1171_s25, 32  ;;  %p1650_p11 = scmp.lt.s32.totalorder %s1171_s25, %s1171_s25 }
 0x72b   : > { %p1644_p8 = scmp.ne.s32.totalorder %s1171_s25, %s1643_s26  ;;  %p1651_p12 = scmp.lt.s32.totalorder %s1643_s26, %s1643_s26 }
 0x72d   : > { %p1645_p9 = pnand %p1644_p8, %p2001_p7  ;;  %p1652_p13 = por %p1651_p12, %p1650_p11 }
 0x72f   : > { %p1646_p10 = pneg %p1645_p9 }
 0x731   : > { %p1653_p0 = pnand %p1652_p13, %p1646_p10 }
 0x733   : > { %1656 = shalt.err (!%p1653_p0)
}
 0x734   : > { %s1657_s12 = scalar_lea.hbm %s2045_s9, 32 }
 0x735   : > { %p1658_p1 = scmp.ne.s32.totalorder %s2045_s9, %s1657_s12  ;;  %p1663_p4 = scmp.lt.u32.totalorder %s1657_s12, %s2045_s9 }
 0x737   : > { %p1659_p2 = pnand %p1658_p1, %p2001_p7 }
 0x739   : > { %p1660_p3 = pneg %p1659_p2 }
 0x73b   : > { %p1665_p5 = pnand %p1663_p4, %p1660_p3 }
 0x73d   : > { %1668 = shalt.err (!%p1665_p5)
}
 0x73e   : > { %1589 = dma.vmem_to_hbm [thread:$0]  (%p2001_p7), %s1171_s25, 32, %s2045_s9, [#allocation4]  }
 0x73f   : > { %1682 = dma.done.wait (%p2001_p7), [#allocation4], 32  }
 0x740   : > { %1684 = vsyncadd (%p2001_p7), [#allocation4], 4294967264 }
 0x741 PF: > { %s20_s11 = sadd.s32 1, %s1695_s11   ;;  %s2047_s30 = smov %s1691_s10 }
 0x742   : > { %p17_p6 = scmp.ge.s32.totalorder %s20_s11, 4   ;;  %s2048_s10 = smov %s2050_s13 }
 0x744   :  { %19 = sbr.rel (!%p17_p6) target bundleno = 2 (0x2), region = 102 }
 0x74b   :  { %1183 = vsyncpa [#allocation4], 1 }
 0x74c   :  { %1185 = vsyncpa [#allocation4 + $0x1], 1 }

</bundles_post_ra>
